<compile_context>
chip_gen: v6e
topology: v6e:2x2x1
jax: 0.10.0
libtpu: 0.0.40
codegen_flags: <defaults>
</compile_context>

<pallas_src>
import numpy as np
import jax
import jax.numpy as jnp
from jax.experimental import pallas as pl
from jax.experimental.pallas import tpu as pltpu

EPS = 1e-5


def _vmem():
    return pl.BlockSpec(memory_space=pltpu.MemorySpace.VMEM)


# ------------------------------ fused kernel ------------------------------- #

def _digits_fused_kernel(x_ref, w1_ref, w2_ref, wf_ref, vec_ref, o_ref):
    x = x_ref[...]                                   # (N, 64) flattened 8x8 images
    v = vec_ref[...]                                 # (1, 30) packed per-channel vectors
    g1, be1 = v[:, 0:7], v[:, 7:14]
    g2, be2 = v[:, 14:17], v[:, 17:20]
    bf = v[:, 20:30]
    n = x.shape[0]

    # conv1 (3x3, 1->7) as a dense matmul; conv bias omitted (cancels in train-mode BN).
    # Output column = d*63 + q*7 + c  (d: pool candidate, q: pooled position, c: channel).
    y1 = jnp.dot(x, w1_ref[...], preferred_element_type=jnp.float32)      # (N, 252)

    # BatchNorm1 (training-mode batch stats, single pass: sum & sum of squares).
    cs = jnp.sum(y1, axis=0, keepdims=True)                               # (1, 252)
    css = jnp.sum(y1 * y1, axis=0, keepdims=True)                         # (1, 252)
    cs63 = cs[:, 0:63] + cs[:, 63:126] + cs[:, 126:189] + cs[:, 189:252]   # fold 4 pool blocks
    css63 = css[:, 0:63] + css[:, 63:126] + css[:, 126:189] + css[:, 189:252]
    s1 = cs63[:, 0:7]
    s2 = css63[:, 0:7]
    for q in range(1, 9):                                                  # fold 9 pooled positions
        s1 = s1 + cs63[:, 7 * q:7 * q + 7]
        s2 = s2 + css63[:, 7 * q:7 * q + 7]
    inv1 = 1.0 / (n * 36)
    mean1 = s1 * inv1                                                      # (1, 7)
    var1 = s2 * inv1 - mean1 * mean1                                       # biased var (torch BN)
    a1 = g1 * jax.lax.rsqrt(var1 + EPS)
    b1 = be1 - mean1 * a1
    a1c = jnp.concatenate([a1] * 9, axis=1)                                # (1, 63)
    b1c = jnp.concatenate([b1] * 9, axis=1)
    a1c = jnp.concatenate([a1c] * 4, axis=1)                               # (1, 252)
    b1c = jnp.concatenate([b1c] * 4, axis=1)
    h1 = jnp.maximum(y1 * a1c + b1c, 0.0)                                  # BN + relu, (N, 252)

    # 2x2 max pool == max over the 4 contiguous candidate blocks.
    pooled = jnp.maximum(jnp.maximum(h1[:, 0:63], h1[:, 63:126]),
                         jnp.maximum(h1[:, 126:189], h1[:, 189:252]))      # (N, 63)

    # conv2 (2x2, 7->3) as a dense matmul; output column = p*3 + o (p: position, o: channel).
    y2 = jnp.dot(pooled, w2_ref[...], preferred_element_type=jnp.float32)  # (N, 12)

    # BatchNorm2 (train mode) + relu.
    cs2 = jnp.sum(y2, axis=0, keepdims=True)
    css2 = jnp.sum(y2 * y2, axis=0, keepdims=True)
    t1 = cs2[:, 0:3] + cs2[:, 3:6] + cs2[:, 6:9] + cs2[:, 9:12]            # (1, 3)
    t2 = css2[:, 0:3] + css2[:, 3:6] + css2[:, 6:9] + css2[:, 9:12]
    inv2 = 1.0 / (n * 4)
    mean2 = t1 * inv2
    var2 = t2 * inv2 - mean2 * mean2
    a2 = g2 * jax.lax.rsqrt(var2 + EPS)
    b2 = be2 - mean2 * a2
    a2c = jnp.concatenate([a2] * 4, axis=1)                                # (1, 12)
    b2c = jnp.concatenate([b2] * 4, axis=1)
    h2 = jnp.maximum(y2 * a2c + b2c, 0.0)                                  # (N, 12)

    # fc (weights pre-permuted to the (p, o) column order -> no activation transpose).
    o_ref[...] = jnp.dot(h2, wf_ref[...], preferred_element_type=jnp.float32) + bf


# --------------------------- host-side weight prep -------------------------- #

def pack_params(params):
    """One-time host-side repacking of the torch-layout parameters into kernel constants."""
    w1, b1, g1, be1, w2, b2, g2, be2, wf, bf = [np.asarray(p, np.float32) for p in params]
    del b1, b2  # conv biases are exact no-ops before train-mode BatchNorm

    # conv1 as a dense (64 -> 252) matrix; output col = d*63 + q*7 + c with
    # d = pool candidate (di*2+dj), q = pooled position (pi*3+pj), c = conv1 channel.
    w1d = np.zeros((64, 252), np.float32)
    for pi in range(3):
        for pj in range(3):
            for di in range(2):
                for dj in range(2):
                    i, j = 2 * pi + di, 2 * pj + dj            # conv1 output position (6x6)
                    col0 = (di * 2 + dj) * 63 + (pi * 3 + pj) * 7
                    for c in range(7):
                        for ki in range(3):
                            for kj in range(3):
                                w1d[(i + ki) * 8 + (j + kj), col0 + c] += w1[c, 0, ki, kj]

    # conv2 as a dense (63 -> 12) matrix; input col = q*7 + c, output col = p*3 + o.
    w2d = np.zeros((63, 12), np.float32)
    for oi in range(2):
        for oj in range(2):
            p = oi * 2 + oj
            for ki in range(2):
                for kj in range(2):
                    q = (oi + ki) * 3 + (oj + kj)
                    for o in range(3):
                        for c in range(7):
                            w2d[q * 7 + c, p * 3 + o] += w2[o, c, ki, kj]

    # fc weights permuted so rows match the kernel's (p, o) activation column order
    # (torch flattens (N,3,2,2) as feature index o*4 + p).
    wfp = np.zeros((12, 10), np.float32)
    for p in range(4):
        for o in range(3):
            wfp[p * 3 + o, :] = wf[:, o * 4 + p]

    vecs = np.concatenate([g1, be1, g2, be2, bf]).reshape(1, 30).astype(np.float32)
    return (jnp.asarray(w1d), jnp.asarray(w2d), jnp.asarray(wfp), jnp.asarray(vecs))


# ------------------------------- forward pass ------------------------------ #

def digits_convnet_forward(x, packed):
    """x: (N, 8, 8) float32 -> (N, 10) float32, one fused Pallas kernel."""
    w1d, w2d, wfp, vecs = packed
    N = x.shape[0]
    x2 = x.reshape(N, 64)
    return pl.pallas_call(
        _digits_fused_kernel,
        out_shape=jax.ShapeDtypeStruct((N, 10), jnp.float32),
        in_specs=[_vmem()] * 5,
        out_specs=_vmem(),
    )(x2, w1d, w2d, wfp, vecs)


# ---------------------------- pure-JAX reference --------------------------- #

def _bn_train(y, g, b):
    m = jnp.mean(y, axis=(0, 2, 3), keepdims=True)
    v = jnp.mean((y - m) ** 2, axis=(0, 2, 3), keepdims=True)
    return (y - m) * jax.lax.rsqrt(v + EPS) * g[None, :, None, None] + b[None, :, None, None]


def reference_forward(x, params):
    w1, b1, g1, be1, w2, b2, g2, be2, wf, bf = params
    hp = jax.lax.Precision.HIGHEST
    xi = x[:, None, :, :]                                            # NCHW
    y = jax.lax.conv_general_dilated(xi, w1, (1, 1), 'VALID',
                                     dimension_numbers=('NCHW', 'OIHW', 'NCHW'),
                                     precision=hp) + b1[None, :, None, None]
    y = jnp.maximum(_bn_train(y, g1, be1), 0.0)
    y = jax.lax.reduce_window(y, -jnp.inf, jax.lax.max, (1, 1, 2, 2), (1, 1, 2, 2), 'VALID')
    y = jax.lax.conv_general_dilated(y, w2, (1, 1), 'VALID',
                                     dimension_numbers=('NCHW', 'OIHW', 'NCHW'),
                                     precision=hp) + b2[None, :, None, None]
    y = jnp.maximum(_bn_train(y, g2, be2), 0.0)
    y = y.reshape(y.shape[0], -1)
    return jnp.dot(y, wf.T, precision=hp) + bf


# ----------------------------------- main ----------------------------------- #

if __name__ == "__main__":
    key = jax.random.PRNGKey(0)
    ks = jax.random.split(key, 11)
    N = 4

    w1 = jax.random.normal(ks[0], (7, 1, 3, 3), jnp.float32) * 0.3
    b1 = jax.random.normal(ks[1], (7,), jnp.float32) * 0.1
    g1 = 1.0 + 0.1 * jax.random.normal(ks[2], (7,), jnp.float32)
    be1 = 0.1 * jax.random.normal(ks[3], (7,), jnp.float32)
    w2 = jax.random.normal(ks[4], (3, 7, 2, 2), jnp.float32) * 0.3
    b2 = jax.random.normal(ks[5], (3,), jnp.float32) * 0.1
    g2 = 1.0 + 0.1 * jax.random.normal(ks[6], (3,), jnp.float32)
    be2 = 0.1 * jax.random.normal(ks[7], (3,), jnp.float32)
    wf = jax.random.normal(ks[8], (10, 12), jnp.float32) * 0.3
    bf = jax.random.normal(ks[9], (10,), jnp.float32) * 0.1
    params = (w1, b1, g1, be1, w2, b2, g2, be2, wf, bf)

    x = jax.random.normal(ks[10], (N, 8, 8), jnp.float32)

    packed = pack_params(params)                       # one-time host-side weight repacking
    out = jax.block_until_ready(digits_convnet_forward(x, packed))
    ref = jax.block_until_ready(reference_forward(x, params))

    assert out.shape == (N, 10), out.shape
    assert jnp.allclose(out, ref, rtol=1e-3, atol=1e-3), (out, ref)
    print("KERNEL_OK")
</pallas_src>

<mosaic_0001>
module attributes {stable_mosaic.version = 11 : i64} {
  func.func @_digits_fused_kernel(%arg0: memref<4x64xf32, #tpu.memory_space<vmem>>, %arg1: memref<64x252xf32, #tpu.memory_space<vmem>>, %arg2: memref<63x12xf32, #tpu.memory_space<vmem>>, %arg3: memref<12x10xf32, #tpu.memory_space<vmem>>, %arg4: memref<1x30xf32, #tpu.memory_space<vmem>>, %arg5: memref<4x10xf32, #tpu.memory_space<vmem>>) attributes {dimension_semantics = [], scalar_prefetch = 0 : i64, scratch_operands = 0 : i64, tpu.core_type = #tpu.core_type<tc>} {
    %c0 = arith.constant 0 : index
    %c0_0 = arith.constant 0 : index
    %0 = vector.load %arg0[%c0, %c0_0] : memref<4x64xf32, #tpu.memory_space<vmem>>, vector<4x64xf32>
    %c0_1 = arith.constant 0 : index
    %c0_2 = arith.constant 0 : index
    %1 = vector.load %arg4[%c0_1, %c0_2] : memref<1x30xf32, #tpu.memory_space<vmem>>, vector<1x30xf32>
    %2 = vector.extract_strided_slice %1 {offsets = [0, 0], sizes = [1, 7], strides = [1, 1]} : vector<1x30xf32> to vector<1x7xf32>
    %3 = vector.extract_strided_slice %1 {offsets = [0, 7], sizes = [1, 7], strides = [1, 1]} : vector<1x30xf32> to vector<1x7xf32>
    %4 = vector.extract_strided_slice %1 {offsets = [0, 14], sizes = [1, 3], strides = [1, 1]} : vector<1x30xf32> to vector<1x3xf32>
    %5 = vector.extract_strided_slice %1 {offsets = [0, 17], sizes = [1, 3], strides = [1, 1]} : vector<1x30xf32> to vector<1x3xf32>
    %6 = vector.extract_strided_slice %1 {offsets = [0, 20], sizes = [1, 10], strides = [1, 1]} : vector<1x30xf32> to vector<1x10xf32>
    %c0_3 = arith.constant 0 : index
    %c0_4 = arith.constant 0 : index
    %7 = vector.load %arg1[%c0_3, %c0_4] : memref<64x252xf32, #tpu.memory_space<vmem>>, vector<64x252xf32>
    %cst = arith.constant dense<0.000000e+00> : vector<4x252xf32>
    %8 = tpu.matmul %0, %7, %cst {dimension_numbers = #tpu.dot_dimension_numbers<[1], [0], [0], [1], [0, 0, 1, 1], [], []>} : vector<4x64xf32>, vector<64x252xf32>, vector<4x252xf32> -> vector<4x252xf32>
    %cst_5 = arith.constant dense<0.000000e+00> : vector<252xf32>
    %9 = vector.multi_reduction <add>, %8, %cst_5 [0] : vector<4x252xf32> to vector<252xf32>
    %10 = vector.shape_cast %9 : vector<252xf32> to vector<1x252xf32>
    %11 = arith.mulf %8, %8 : vector<4x252xf32>
    %cst_6 = arith.constant dense<0.000000e+00> : vector<252xf32>
    %12 = vector.multi_reduction <add>, %11, %cst_6 [0] : vector<4x252xf32> to vector<252xf32>
    %13 = vector.shape_cast %12 : vector<252xf32> to vector<1x252xf32>
    %14 = vector.extract_strided_slice %10 {offsets = [0, 0], sizes = [1, 63], strides = [1, 1]} : vector<1x252xf32> to vector<1x63xf32>
    %15 = vector.extract_strided_slice %10 {offsets = [0, 63], sizes = [1, 63], strides = [1, 1]} : vector<1x252xf32> to vector<1x63xf32>
    %16 = arith.addf %14, %15 : vector<1x63xf32>
    %17 = vector.extract_strided_slice %10 {offsets = [0, 126], sizes = [1, 63], strides = [1, 1]} : vector<1x252xf32> to vector<1x63xf32>
    %18 = arith.addf %16, %17 : vector<1x63xf32>
    %19 = vector.extract_strided_slice %10 {offsets = [0, 189], sizes = [1, 63], strides = [1, 1]} : vector<1x252xf32> to vector<1x63xf32>
    %20 = arith.addf %18, %19 : vector<1x63xf32>
    %21 = vector.extract_strided_slice %13 {offsets = [0, 0], sizes = [1, 63], strides = [1, 1]} : vector<1x252xf32> to vector<1x63xf32>
    %22 = vector.extract_strided_slice %13 {offsets = [0, 63], sizes = [1, 63], strides = [1, 1]} : vector<1x252xf32> to vector<1x63xf32>
    %23 = arith.addf %21, %22 : vector<1x63xf32>
    %24 = vector.extract_strided_slice %13 {offsets = [0, 126], sizes = [1, 63], strides = [1, 1]} : vector<1x252xf32> to vector<1x63xf32>
    %25 = arith.addf %23, %24 : vector<1x63xf32>
    %26 = vector.extract_strided_slice %13 {offsets = [0, 189], sizes = [1, 63], strides = [1, 1]} : vector<1x252xf32> to vector<1x63xf32>
    %27 = arith.addf %25, %26 : vector<1x63xf32>
    %28 = vector.extract_strided_slice %20 {offsets = [0, 0], sizes = [1, 7], strides = [1, 1]} : vector<1x63xf32> to vector<1x7xf32>
    %29 = vector.extract_strided_slice %27 {offsets = [0, 0], sizes = [1, 7], strides = [1, 1]} : vector<1x63xf32> to vector<1x7xf32>
    %30 = vector.extract_strided_slice %20 {offsets = [0, 7], sizes = [1, 7], strides = [1, 1]} : vector<1x63xf32> to vector<1x7xf32>
    %31 = arith.addf %28, %30 : vector<1x7xf32>
    %32 = vector.extract_strided_slice %27 {offsets = [0, 7], sizes = [1, 7], strides = [1, 1]} : vector<1x63xf32> to vector<1x7xf32>
    %33 = arith.addf %29, %32 : vector<1x7xf32>
    %34 = vector.extract_strided_slice %20 {offsets = [0, 14], sizes = [1, 7], strides = [1, 1]} : vector<1x63xf32> to vector<1x7xf32>
    %35 = arith.addf %31, %34 : vector<1x7xf32>
    %36 = vector.extract_strided_slice %27 {offsets = [0, 14], sizes = [1, 7], strides = [1, 1]} : vector<1x63xf32> to vector<1x7xf32>
    %37 = arith.addf %33, %36 : vector<1x7xf32>
    %38 = vector.extract_strided_slice %20 {offsets = [0, 21], sizes = [1, 7], strides = [1, 1]} : vector<1x63xf32> to vector<1x7xf32>
    %39 = arith.addf %35, %38 : vector<1x7xf32>
    %40 = vector.extract_strided_slice %27 {offsets = [0, 21], sizes = [1, 7], strides = [1, 1]} : vector<1x63xf32> to vector<1x7xf32>
    %41 = arith.addf %37, %40 : vector<1x7xf32>
    %42 = vector.extract_strided_slice %20 {offsets = [0, 28], sizes = [1, 7], strides = [1, 1]} : vector<1x63xf32> to vector<1x7xf32>
    %43 = arith.addf %39, %42 : vector<1x7xf32>
    %44 = vector.extract_strided_slice %27 {offsets = [0, 28], sizes = [1, 7], strides = [1, 1]} : vector<1x63xf32> to vector<1x7xf32>
    %45 = arith.addf %41, %44 : vector<1x7xf32>
    %46 = vector.extract_strided_slice %20 {offsets = [0, 35], sizes = [1, 7], strides = [1, 1]} : vector<1x63xf32> to vector<1x7xf32>
    %47 = arith.addf %43, %46 : vector<1x7xf32>
    %48 = vector.extract_strided_slice %27 {offsets = [0, 35], sizes = [1, 7], strides = [1, 1]} : vector<1x63xf32> to vector<1x7xf32>
    %49 = arith.addf %45, %48 : vector<1x7xf32>
    %50 = vector.extract_strided_slice %20 {offsets = [0, 42], sizes = [1, 7], strides = [1, 1]} : vector<1x63xf32> to vector<1x7xf32>
    %51 = arith.addf %47, %50 : vector<1x7xf32>
    %52 = vector.extract_strided_slice %27 {offsets = [0, 42], sizes = [1, 7], strides = [1, 1]} : vector<1x63xf32> to vector<1x7xf32>
    %53 = arith.addf %49, %52 : vector<1x7xf32>
    %54 = vector.extract_strided_slice %20 {offsets = [0, 49], sizes = [1, 7], strides = [1, 1]} : vector<1x63xf32> to vector<1x7xf32>
    %55 = arith.addf %51, %54 : vector<1x7xf32>
    %56 = vector.extract_strided_slice %27 {offsets = [0, 49], sizes = [1, 7], strides = [1, 1]} : vector<1x63xf32> to vector<1x7xf32>
    %57 = arith.addf %53, %56 : vector<1x7xf32>
    %58 = vector.extract_strided_slice %20 {offsets = [0, 56], sizes = [1, 7], strides = [1, 1]} : vector<1x63xf32> to vector<1x7xf32>
    %59 = arith.addf %55, %58 : vector<1x7xf32>
    %60 = vector.extract_strided_slice %27 {offsets = [0, 56], sizes = [1, 7], strides = [1, 1]} : vector<1x63xf32> to vector<1x7xf32>
    %61 = arith.addf %57, %60 : vector<1x7xf32>
    %cst_7 = arith.constant 0.0069444445 : f32
    %62 = vector.broadcast %cst_7 : f32 to vector<1x7xf32>
    %63 = arith.mulf %59, %62 : vector<1x7xf32>
    %cst_8 = arith.constant 0.0069444445 : f32
    %64 = vector.broadcast %cst_8 : f32 to vector<1x7xf32>
    %65 = arith.mulf %61, %64 : vector<1x7xf32>
    %66 = arith.mulf %63, %63 : vector<1x7xf32>
    %67 = arith.subf %65, %66 : vector<1x7xf32>
    %cst_9 = arith.constant 9.99999974E-6 : f32
    %68 = vector.broadcast %cst_9 : f32 to vector<1x7xf32>
    %69 = arith.addf %67, %68 : vector<1x7xf32>
    %70 = math.rsqrt %69 : vector<1x7xf32>
    %71 = arith.mulf %2, %70 : vector<1x7xf32>
    %72 = arith.mulf %63, %71 : vector<1x7xf32>
    %73 = arith.subf %3, %72 : vector<1x7xf32>
    %74 = tpu.concatenate %71, %71, %71, %71, %71, %71, %71, %71, %71 in 1 : vector<1x7xf32>, vector<1x7xf32>, vector<1x7xf32>, vector<1x7xf32>, vector<1x7xf32>, vector<1x7xf32>, vector<1x7xf32>, vector<1x7xf32>, vector<1x7xf32> -> vector<1x63xf32>
    %75 = tpu.concatenate %73, %73, %73, %73, %73, %73, %73, %73, %73 in 1 : vector<1x7xf32>, vector<1x7xf32>, vector<1x7xf32>, vector<1x7xf32>, vector<1x7xf32>, vector<1x7xf32>, vector<1x7xf32>, vector<1x7xf32>, vector<1x7xf32> -> vector<1x63xf32>
    %76 = tpu.concatenate %74, %74, %74, %74 in 1 : vector<1x63xf32>, vector<1x63xf32>, vector<1x63xf32>, vector<1x63xf32> -> vector<1x252xf32>
    %77 = tpu.concatenate %75, %75, %75, %75 in 1 : vector<1x63xf32>, vector<1x63xf32>, vector<1x63xf32>, vector<1x63xf32> -> vector<1x252xf32>
    %78 = vector.broadcast %76 : vector<1x252xf32> to vector<4x252xf32>
    %79 = arith.mulf %8, %78 : vector<4x252xf32>
    %80 = vector.broadcast %77 : vector<1x252xf32> to vector<4x252xf32>
    %81 = arith.addf %79, %80 : vector<4x252xf32>
    %cst_10 = arith.constant 0.000000e+00 : f32
    %82 = vector.broadcast %cst_10 : f32 to vector<4x252xf32>
    %83 = arith.maximumf %81, %82 : vector<4x252xf32>
    %84 = vector.extract_strided_slice %83 {offsets = [0, 0], sizes = [4, 63], strides = [1, 1]} : vector<4x252xf32> to vector<4x63xf32>
    %85 = vector.extract_strided_slice %83 {offsets = [0, 63], sizes = [4, 63], strides = [1, 1]} : vector<4x252xf32> to vector<4x63xf32>
    %86 = arith.maximumf %84, %85 : vector<4x63xf32>
    %87 = vector.extract_strided_slice %83 {offsets = [0, 126], sizes = [4, 63], strides = [1, 1]} : vector<4x252xf32> to vector<4x63xf32>
    %88 = vector.extract_strided_slice %83 {offsets = [0, 189], sizes = [4, 63], strides = [1, 1]} : vector<4x252xf32> to vector<4x63xf32>
    %89 = arith.maximumf %87, %88 : vector<4x63xf32>
    %90 = arith.maximumf %86, %89 : vector<4x63xf32>
    %c0_11 = arith.constant 0 : index
    %c0_12 = arith.constant 0 : index
    %91 = vector.load %arg2[%c0_11, %c0_12] : memref<63x12xf32, #tpu.memory_space<vmem>>, vector<63x12xf32>
    %cst_13 = arith.constant dense<0.000000e+00> : vector<4x12xf32>
    %92 = tpu.matmul %90, %91, %cst_13 {dimension_numbers = #tpu.dot_dimension_numbers<[1], [0], [0], [1], [0, 0, 1, 1], [], []>} : vector<4x63xf32>, vector<63x12xf32>, vector<4x12xf32> -> vector<4x12xf32>
    %cst_14 = arith.constant dense<0.000000e+00> : vector<12xf32>
    %93 = vector.multi_reduction <add>, %92, %cst_14 [0] : vector<4x12xf32> to vector<12xf32>
    %94 = vector.shape_cast %93 : vector<12xf32> to vector<1x12xf32>
    %95 = arith.mulf %92, %92 : vector<4x12xf32>
    %cst_15 = arith.constant dense<0.000000e+00> : vector<12xf32>
    %96 = vector.multi_reduction <add>, %95, %cst_15 [0] : vector<4x12xf32> to vector<12xf32>
    %97 = vector.shape_cast %96 : vector<12xf32> to vector<1x12xf32>
    %98 = vector.extract_strided_slice %94 {offsets = [0, 0], sizes = [1, 3], strides = [1, 1]} : vector<1x12xf32> to vector<1x3xf32>
    %99 = vector.extract_strided_slice %94 {offsets = [0, 3], sizes = [1, 3], strides = [1, 1]} : vector<1x12xf32> to vector<1x3xf32>
    %100 = arith.addf %98, %99 : vector<1x3xf32>
    %101 = vector.extract_strided_slice %94 {offsets = [0, 6], sizes = [1, 3], strides = [1, 1]} : vector<1x12xf32> to vector<1x3xf32>
    %102 = arith.addf %100, %101 : vector<1x3xf32>
    %103 = vector.extract_strided_slice %94 {offsets = [0, 9], sizes = [1, 3], strides = [1, 1]} : vector<1x12xf32> to vector<1x3xf32>
    %104 = arith.addf %102, %103 : vector<1x3xf32>
    %105 = vector.extract_strided_slice %97 {offsets = [0, 0], sizes = [1, 3], strides = [1, 1]} : vector<1x12xf32> to vector<1x3xf32>
    %106 = vector.extract_strided_slice %97 {offsets = [0, 3], sizes = [1, 3], strides = [1, 1]} : vector<1x12xf32> to vector<1x3xf32>
    %107 = arith.addf %105, %106 : vector<1x3xf32>
    %108 = vector.extract_strided_slice %97 {offsets = [0, 6], sizes = [1, 3], strides = [1, 1]} : vector<1x12xf32> to vector<1x3xf32>
    %109 = arith.addf %107, %108 : vector<1x3xf32>
    %110 = vector.extract_strided_slice %97 {offsets = [0, 9], sizes = [1, 3], strides = [1, 1]} : vector<1x12xf32> to vector<1x3xf32>
    %111 = arith.addf %109, %110 : vector<1x3xf32>
    %cst_16 = arith.constant 6.250000e-02 : f32
    %112 = vector.broadcast %cst_16 : f32 to vector<1x3xf32>
    %113 = arith.mulf %104, %112 : vector<1x3xf32>
    %cst_17 = arith.constant 6.250000e-02 : f32
    %114 = vector.broadcast %cst_17 : f32 to vector<1x3xf32>
    %115 = arith.mulf %111, %114 : vector<1x3xf32>
    %116 = arith.mulf %113, %113 : vector<1x3xf32>
    %117 = arith.subf %115, %116 : vector<1x3xf32>
    %cst_18 = arith.constant 9.99999974E-6 : f32
    %118 = vector.broadcast %cst_18 : f32 to vector<1x3xf32>
    %119 = arith.addf %117, %118 : vector<1x3xf32>
    %120 = math.rsqrt %119 : vector<1x3xf32>
    %121 = arith.mulf %4, %120 : vector<1x3xf32>
    %122 = arith.mulf %113, %121 : vector<1x3xf32>
    %123 = arith.subf %5, %122 : vector<1x3xf32>
    %124 = tpu.concatenate %121, %121, %121, %121 in 1 : vector<1x3xf32>, vector<1x3xf32>, vector<1x3xf32>, vector<1x3xf32> -> vector<1x12xf32>
    %125 = tpu.concatenate %123, %123, %123, %123 in 1 : vector<1x3xf32>, vector<1x3xf32>, vector<1x3xf32>, vector<1x3xf32> -> vector<1x12xf32>
    %126 = vector.broadcast %124 : vector<1x12xf32> to vector<4x12xf32>
    %127 = arith.mulf %92, %126 : vector<4x12xf32>
    %128 = vector.broadcast %125 : vector<1x12xf32> to vector<4x12xf32>
    %129 = arith.addf %127, %128 : vector<4x12xf32>
    %cst_19 = arith.constant 0.000000e+00 : f32
    %130 = vector.broadcast %cst_19 : f32 to vector<4x12xf32>
    %131 = arith.maximumf %129, %130 : vector<4x12xf32>
    %c0_20 = arith.constant 0 : index
    %c0_21 = arith.constant 0 : index
    %132 = vector.load %arg3[%c0_20, %c0_21] : memref<12x10xf32, #tpu.memory_space<vmem>>, vector<12x10xf32>
    %cst_22 = arith.constant dense<0.000000e+00> : vector<4x10xf32>
    %133 = tpu.matmul %131, %132, %cst_22 {dimension_numbers = #tpu.dot_dimension_numbers<[1], [0], [0], [1], [0, 0, 1, 1], [], []>} : vector<4x12xf32>, vector<12x10xf32>, vector<4x10xf32> -> vector<4x10xf32>
    %134 = vector.broadcast %6 : vector<1x10xf32> to vector<4x10xf32>
    %135 = arith.addf %133, %134 : vector<4x10xf32>
    %c0_23 = arith.constant 0 : index
    %c0_24 = arith.constant 0 : index
    %136 = vector.load %arg5[%c0_23, %c0_24] : memref<4x10xf32, #tpu.memory_space<vmem>>, vector<4x10xf32>
    tpu.vector_store %arg5[%c0_23, %c0_24], %135 {strides = array<i32>} : memref<4x10xf32, #tpu.memory_space<vmem>>, vector<4x10xf32>,
    return
  }
}

</mosaic_0001>

<bundles_post_ra>
// kernel: tpu_custom_call.1
= control target key start
LH: loop header
LB: loop body
LE: loop exit
PB: predicated region body
PF: predicated region fallthrough
CT: control target
= control target key end

     0   :  { %10 = vsyncpa [#allocation3], 0  ;;  %s1125_s0 = inlined_call_operand.vmem [shape: f32[4,64], index: 0, kind: input, shape index: {}]   ;;  %s1126_s1 = inlined_call_operand.hbm [shape: f32[64,252], index: 1, kind: input, shape index: {}]   ;;  %s1127_s2 = inlined_call_operand.vmem [shape: f32[63,12], index: 2, kind: input, shape index: {}]   ;;  %s1128_s3 = inlined_call_operand.vmem [shape: f32[12,10], index: 3, kind: input, shape index: {}]   ;;  %s1129_s4 = inlined_call_operand.vmem [shape: f32[1,30], index: 4, kind: input, shape index: {}]   ;;  %s1130_s5 = inlined_call_operand.hbm [shape: f32[4,10], index: 5, kind: output, shape index: {}]  }
   0x1   :  { %11 = vsyncpa [#allocation4], 0  ;;  %s900_s18 = smov [#allocation2]  }
   0x2   :  { %s19_s19 = sshll.u32 %s900_s18, 4  ;;  %s20_s19 = int_to_ptr.vmem [resolvable:$true] %s19_s19 }
   0x3   :  { %s864_s20 = scalar_lea.vmem %s20_s19, 2048  ;;  %p869_p1 = scmp.lt.s32.totalorder %s20_s19, %s20_s19 }
   0x4   :  { %p865_p0 = scmp.ne.s32.totalorder %s20_s19, %s864_s20  ;;  %p870_p2 = scmp.lt.s32.totalorder %s864_s20, %s864_s20 }
   0x6   :  { %p871_p3 = por %p870_p2, %p869_p1 }
   0x8   :  { %p872_p4 = pnand %p871_p3, %p865_p0 }
   0xa   :  { %875 = shalt.err (!%p872_p4)
}
   0xb   :  { %s901_s21 = smov 256   ;;  %s902_s22 = smov 16  }
   0xc   :  { %25 = dma.hbm_to_vmem [thread:$0]  %s1126_s1, 2048, %s20_s19, [#allocation3], %s901_s21, %s901_s21, %s902_s22  }
   0xd   :  { %896 = dma.done.wait [#allocation3], 2048  }
   0xe   :  { %897 = vsyncadd [#allocation3], 4294965248  ;;  %v903_v0 = vmov 0.0   ;;  %v52_v1 = vld [vmem:[#allocation2 + $0x78] sm:$0xff]  ;;  %v51_v2 = vld [vmem:[#allocation2 + $0x70] sm:$0xff]  ;;  %vm53_vm0 = vcmask 523264  }
   0xf   :  { %121 = vmatprep.mubr.f32.mxu0 %v903_v0  ;;  %788 = vmatprep.subr.mxu1 %v903_v0  ;;  %v50_v3 = vld [vmem:[#allocation2 + $0x68] sm:$0xff]  ;;  %v49_v4 = vld [vmem:[#allocation2 + $0x60] sm:$0xff]  ;;  %v48_v5 = vld [vmem:[#allocation2 + $0x58] sm:$0xff]  ;;  %vm128_vm1 = vcmask 1043456   ;;  %vm136_vm2 = vcmask 1010688   ;;  %s905_s26 = smov 2  }
  0x10   :  { %73 = vmatprep.subr.mxu0 %v52_v1  ;;  %v47_v6 = vld [vmem:[#allocation2 + $0x50] sm:$0xff]  ;;  %v46_v7 = vld [vmem:[#allocation2 + $0x48] sm:$0xff]  ;;  %v45_v8 = vld [vmem:[#allocation2 + $0x40] sm:$0xff]  ;;  %s906_s27 = smov 67   ;;  %vm170_vm3 = vcmask 15360   ;;  %s907_s28 = smov 121  }
  0x11   :  { %74 = vmatpush1.msra.mxu0 %v51_v2  ;;  %v44_v9 = vld [vmem:[#allocation2 + $0x38] sm:$0xff]  ;;  %v43_v10 = vld [vmem:[#allocation2 + $0x30] sm:$0xff]  ;;  %v42_v11 = vld [vmem:[#allocation2 + $0x28] sm:$0xff]  ;;  %s908_s29 = smov 114   ;;  %s909_s30 = smov 107   ;;  %vm317_vm4 = vcmask 56320  }
  0x12   :  { %75 = vmatprep.subr.mxu0 %v50_v3  ;;  %v41_v12 = vld [vmem:[#allocation2 + $0x20] sm:$0xff]  ;;  %v40_v13 = vld [vmem:[#allocation2 + $0x18] sm:$0xff]  ;;  %v39_v14 = vld [vmem:[#allocation2 + $0x10] sm:$0xff]  ;;  %s910_s6 = smov 100   ;;  %s911_s7 = smov 93   ;;  %vm319_vm5 = vcmask 113664  }
  0x13   :  { %76 = vmatpush1.msra.mxu0 %v49_v4  ;;  %v38_v15 = vld [vmem:[#allocation2 + $0x8] sm:$0xff]  ;;  %v37_v16 = vld [vmem:[#allocation2] sm:$0xff]  ;;  %s912_s8 = smov 86   ;;  %s913_s9 = smov 79   ;;  %vm321_vm6 = vcmask 171008   ;;  %vm323_vm7 = vcmask 228352  }
  0x14   :  { %77 = vmatprep.subr.mxu0 %v48_v5  ;;  %v35_v17 = vld [vmem:[%s1125_s0] sm:$0xf]  ;;  %s904_s0 = smov 65   ;;  %s914_s10 = smov 72   ;;  %vm325_vm8 = vcmask 285696   ;;  %vm327_vm9 = vcmask 343040  }
  0x15   :  { %78 = vmatpush1.msra.mxu0 %v47_v6  ;;  %s916_s13 = smov 7   ;;  %s917_s14 = smov 21   ;;  %vm329_vm10 = vcmask 400384   ;;  %vm331_vm11 = vcmask 457728   ;;  %vm384_vm12 = vcmask 498688   ;;  %vm380_vm13 = vcmask 515072  }
  0x16   :  { %79 = vmatprep.subr.mxu0 %v46_v7  ;;  %s919_s15 = smov 14   ;;  %s920_s16 = smov 35   ;;  %vm452_vm14 = vcmask 1046528   ;;  %vm382_vm15 = vcmask 1031168  }
  0x17   :  { %80 = vmatpush1.msra.mxu0 %v45_v8  ;;  %s921_s17 = smov 42   ;;  %s922_s18 = smov 49  }
  0x18   :  { %81 = vmatprep.subr.mxu0 %v44_v9  ;;  %s923_s19 = smov 56   ;;  %s924_s20 = smov 126  }
  0x19   :  { %82 = vmatpush1.msra.mxu0 %v43_v10  ;;  %s925_s21 = smov 61   ;;  %s926_s22 = smov 63  }
  0x1a   :  { %83 = vmatprep.subr.mxu0 %v42_v11  ;;  %s936_s23 = smov 108  }
  0x1b   :  { %84 = vmatpush1.msra.mxu0 %v41_v12 }
  0x1c   :  { %85 = vmatprep.subr.mxu0 %v40_v13 }
  0x1d   :  { %86 = vmatpush1.msra.mxu0 %v39_v14 }
  0x1e   :  { %87 = vmatprep.subr.mxu0 %v38_v15 }
  0x1f   :  { %88 = vmatpush1.msra.mxu0 %v37_v16 }
  0x20   :  { %771 = vmatmul.mubr.msk.f32.vlgmr.msra.gmra.mxu0 %vm53_vm0, %v35_v17  ;;  %807 = vmatprep.subr.mxu0 %v903_v0  ;;  %vm927_vm0 = vmmov 0  }
  0x21   :  { %804 = vmatprep.mubr.msk.f32.mxu1 %vm927_vm0, %v903_v0  ;;  %811 = vmatprep.mubr.msk.f32.mxu0 %vm927_vm0, %v903_v0 }
  0xe0   :  { %v977_v18 = vpop.f32.mrf.mxu0 }
  0xe1   :  { %v129_v19 = vsel %vm128_vm1, %v977_v18, 0.0  ;;  %v144_v20 = vmul.f32 %v977_v18, %v977_v18 }
  0xe2   :  { %v130_v21 = vrot.slane %v129_v19, 4  ;;  %v983_v22 = vpop.f32.mrf.mxu0 }
  0xe3   :  { %v146_v23 = vsel %vm128_vm1, %v144_v20, 0.0  ;;  %v137_v24 = vsel %vm136_vm2, %v983_v22, 0.0  ;;  %v145_v25 = vmul.f32 %v983_v22, %v983_v22 }
  0xe4   :  { %v131_v26 = vadd.f32 %v130_v21, %v129_v19  ;;  %v147_v27 = vrot.slane %v146_v23, 4  ;;  %v138_v28 = vrot.slane %v137_v24, 4 }
  0xe5   :  { %v153_v29 = vsel %vm136_vm2, %v145_v25, 0.0  ;;  %vm526_vm2 = vcmask 93184  }
  0xe6   :  { %v132_v30 = vrot.slane %v131_v26, 2  ;;  %v148_v31 = vadd.f32 %v147_v27, %v146_v23  ;;  %v139_v32 = vadd.f32 %v138_v28, %v137_v24  ;;  %v154_v33 = vrot.slane %v153_v29, 4 }
  0xe8   :  { %v155_v34 = vadd.f32 %v154_v33, %v153_v29  ;;  %v133_v35 = vadd.f32 %v132_v30, %v131_v26  ;;  %v140_v36 = vrot.slane %v139_v32, 2  ;;  %v149_v37 = vrot.slane %v148_v31, 2 }
  0xea   :  { %v134_v38 = vrot.slane %v133_v35, 1  ;;  %v141_v39 = vadd.f32 %v140_v36, %v139_v32  ;;  %v150_v40 = vadd.f32 %v149_v37, %v148_v31  ;;  %v156_v41 = vrot.slane %v155_v34, 2 }
  0xec   :  { %v135_v42 = vadd.f32 %v134_v38, %v133_v35  ;;  %v142_v43 = vrot.slane %v141_v39, 1  ;;  %v151_v45 = vrot.slane %v150_v40, 1  ;;  %v157_v46 = vadd.f32 %v156_v41, %v155_v34 }
  0xee   :  { %161 = vrot.lane.b32.xlu0 %v135_v42, %s904_s0  ;;  %v143_v44 = vadd.f32 %v142_v43, %v141_v39  ;;  %v152_v47 = vadd.f32 %v151_v45, %v150_v40  ;;  %v158_v48 = vrot.slane %v157_v46, 1  ;;  %v915_v43 = vmov 1966171168  }
  0xf0   :  { %168 = vrot.lane.b32.xlu1 %v143_v44, %s905_s26  ;;  %v159_v49 = vadd.f32 %v158_v48, %v157_v46 }
  0xf2   :  { %166 = vrot.lane.b32.xlu0 %v135_v42, %s905_s26 }
  0xf4   :  { %179 = vrot.lane.b32.xlu1 %v152_v47, %s904_s0 }
  0xf6   :  { %184 = vrot.lane.b32.xlu0 %v152_v47, %s905_s26 }
  0xf8   :  { %186 = vrot.lane.b32.xlu1 %v159_v49, %s905_s26 }
  0xfa   :  { %174 = vrot.lane.b32.xlu0 %v143_v44, %s906_s27  ;;  %v271_v44 = vunpack.c.l.s4 %v915_v43 }
  0xfc   :  { %191 = vrot.lane.b32.xlu1 %v159_v49, %s906_s27  ;;  %v272_v46 = vunpack.c.0.s8 %v271_v44 }
 0x160   :  { %v162_v50 = vpop.permute.xlu0 %161 }
 0x161   :  { %v164_v56 = vadd.f32 %v162_v50, %v135_v42  ;;  %v273_v42 = vlaneseq }
 0x162   :  { %v169_v51 = vpop.permute.xlu1 %168 }
 0x163   :  { %v274_v45 = vshrl.u32 %v273_v42, 7 }
 0x164   :  { %v167_v52 = vpop.permute.xlu0 %166 }
 0x165   :  { %v171_v54 = vsel %vm170_vm3, %v167_v52, %v169_v51  ;;  %v1006_v48 = vsub.s32 0, %v274_v45  ;;  %v1009_v51 = vsub.s32 %v272_v46, %v274_v45 }
 0x166   :  { %v180_v53 = vpop.permute.xlu1 %179  ;;  %v173_v60 = vadd.f32 %v171_v54, %v164_v56 }
 0x167   :  { %v182_v57 = vadd.f32 %v180_v53, %v152_v47  ;;  %v1004_v47 = vld [vmem:[%s1129_s4] sm:$0x1]  ;;  %s918_s4 = smov 28  }
 0x168   :  { %v185_v55 = vpop.permute.xlu0 %184 }
 0x16a   :  { %v187_v58 = vpop.permute.xlu1 %186 }
 0x16b   :  { %v188_v59 = vsel %vm170_vm3, %v185_v55, %v187_v58 }
 0x16c   :  { %v175_v61 = vpop.permute.xlu0 %174  ;;  %v190_v62 = vadd.f32 %v188_v59, %v182_v57 }
 0x16d   :  { %v177_v63 = vadd.f32 %v175_v61, %v173_v60 }
 0x16e   :  { %v192_v1 = vpop.permute.xlu1 %191 }
 0x16f   :  { %v194_v2 = vadd.f32 %v192_v1, %v190_v62  ;;  %196 = vrot.lane.b32.xlu0 %v177_v63, %s907_s28 }
 0x171   :  { %201 = vrot.lane.b32.xlu1 %v194_v2, %s907_s28 }
 0x173   :  { %205 = vrot.lane.b32.xlu0 %v177_v63, %s908_s29 }
 0x175   :  { %209 = vrot.lane.b32.xlu1 %v194_v2, %s908_s29 }
 0x177   :  { %213 = vrot.lane.b32.xlu0 %v177_v63, %s909_s30 }
 0x179   :  { %217 = vrot.lane.b32.xlu1 %v194_v2, %s909_s30 }
 0x17b   :  { %221 = vrot.lane.b32.xlu0 %v177_v63, %s910_s6 }
 0x17d   :  { %225 = vrot.lane.b32.xlu1 %v194_v2, %s910_s6 }
 0x17f   :  { %229 = vrot.lane.b32.xlu0 %v177_v63, %s911_s7 }
 0x181   :  { %233 = vrot.lane.b32.xlu1 %v194_v2, %s911_s7 }
 0x183   :  { %237 = vrot.lane.b32.xlu0 %v177_v63, %s912_s8 }
 0x185   :  { %241 = vrot.lane.b32.xlu1 %v194_v2, %s912_s8 }
 0x187   :  { %245 = vrot.lane.b32.xlu0 %v177_v63, %s913_s9 }
 0x189   :  { %249 = vrot.lane.b32.xlu1 %v194_v2, %s913_s9 }
 0x18b   :  { %253 = vrot.lane.b32.xlu0 %v177_v63, %s914_s10 }
 0x18d   :  { %257 = vrot.lane.b32.xlu1 %v194_v2, %s914_s10 }
 0x1e1   :  { %v197_v3 = vpop.permute.xlu0 %196 }
 0x1e2   :  { %v199_v11 = vadd.f32 %v197_v3, %v177_v63 }
 0x1e3   :  { %v202_v4 = vpop.permute.xlu1 %201 }
 0x1e4   :  { %v204_v13 = vadd.f32 %v202_v4, %v194_v2 }
 0x1e5   :  { %v206_v5 = vpop.permute.xlu0 %205 }
 0x1e6   :  { %v208_v14 = vadd.f32 %v206_v5, %v199_v11 }
 0x1e7   :  { %v210_v6 = vpop.permute.xlu1 %209 }
 0x1e8   :  { %v212_v16 = vadd.f32 %v210_v6, %v204_v13 }
 0x1e9   :  { %v214_v7 = vpop.permute.xlu0 %213 }
 0x1ea   :  { %v216_v17 = vadd.f32 %v214_v7, %v208_v14 }
 0x1eb   :  { %v218_v8 = vpop.permute.xlu1 %217 }
 0x1ec   :  { %v220_v20 = vadd.f32 %v218_v8, %v212_v16 }
 0x1ed   :  { %v222_v9 = vpop.permute.xlu0 %221 }
 0x1ee   :  { %v224_v21 = vadd.f32 %v222_v9, %v216_v17 }
 0x1ef   :  { %v226_v10 = vpop.permute.xlu1 %225 }
 0x1f0   :  { %v228_v24 = vadd.f32 %v226_v10, %v220_v20 }
 0x1f1   :  { %v230_v12 = vpop.permute.xlu0 %229 }
 0x1f2   :  { %v232_v25 = vadd.f32 %v230_v12, %v224_v21 }
 0x1f3   :  { %v234_v15 = vpop.permute.xlu1 %233 }
 0x1f4   :  { %v236_v27 = vadd.f32 %v234_v15, %v228_v24 }
 0x1f5   :  { %v238_v19 = vpop.permute.xlu0 %237 }
 0x1f6   :  { %v240_v28 = vadd.f32 %v238_v19, %v232_v25 }
 0x1f7   :  { %v242_v23 = vpop.permute.xlu1 %241 }
 0x1f8   :  { %v244_v30 = vadd.f32 %v242_v23, %v236_v27 }
 0x1f9   :  { %v246_v26 = vpop.permute.xlu0 %245 }
 0x1fa   :  { %v248_v31 = vadd.f32 %v246_v26, %v240_v28 }
 0x1fb   :  { %v250_v29 = vpop.permute.xlu1 %249 }
 0x1fc   :  { %v252_v33 = vadd.f32 %v250_v29, %v244_v30 }
 0x1fd   :  { %v254_v32 = vpop.permute.xlu0 %253 }
 0x1fe   :  { %v256_v34 = vadd.f32 %v254_v32, %v248_v31 }
 0x1ff   :  { %v258_v35 = vpop.permute.xlu1 %257 }
 0x200   :  { %v261_v36 = vmul.f32 0.0069444445, %v256_v34  ;;  %v260_v37 = vadd.f32 %v258_v35, %v252_v33 }
 0x202   :  { %v263_v38 = vmul.f32 %v261_v36, %v261_v36  ;;  %v262_v39 = vmul.f32 0.0069444445, %v260_v37 }
 0x204   :  { %v264_v40 = vsub.f32 %v262_v39, %v263_v38  ;;  %v448_v39 = vld [vmem:[%s1127_s2 + $0x38] sm:$0x7f] }
 0x205   :  { %789 = vmatpush3.msk.msra.mxu1 %vm452_vm14, %v448_v39 }
 0x206   :  { %v265_v41 = vadd.f32 1e-05, %v264_v40  ;;  %v447_v40 = vld [vmem:[%s1127_s2 + $0x30] sm:$0xff]  ;;  %790 = vmatprep.subr.mxu1 %v903_v0 }
 0x207   :  { %791 = vmatpush3.msra.mxu1 %v447_v40 }
 0x208   :  { %852 = vrsqrt.f32 %v265_v41  ;;  %792 = vmatprep.subr.mxu1 %v903_v0 }
 0x215   :  { %v853_v49 = vpop.eup %852 }
 0x216   :  { %v267_v50 = vmul.f32 %v853_v49, %v1004_v47 }
 0x218   :  { %v292_v52 = vrot.slane %v267_v50, %v1006_v48  ;;  %v268_v53 = vmul.f32 %v267_v50, %v261_v36 }
 0x21a   :  { %293 = vrot.lane.b32.xlu1 %v292_v52, %s916_s13  ;;  %v276_v54 = vrot.slane %v268_v53, %v1009_v51 }
 0x21c   :  { %v283_v55 = vrot.slane %v276_v54, %v1009_v51  ;;  %v444_v54 = vld [vmem:[%s1127_s2 + $0x18] sm:$0xff] }
 0x21e   :  { %299 = vrot.lane.b32.xlu1 %v292_v52, %s917_s14  ;;  %284 = vrot.lane.b32.xlu0 %v283_v55, %s916_s13 }
 0x222   :  { %302 = vrot.lane.b32.xlu1 %v292_v52, %s918_s4  ;;  %296 = vrot.lane.b32.xlu0 %v292_v52, %s919_s15 }
 0x226   :  { %305 = vrot.lane.b32.xlu1 %v292_v52, %s920_s16 }
 0x22a   :  { %308 = vrot.lane.b32.xlu1 %v292_v52, %s921_s17 }
 0x22e   :  { %311 = vrot.lane.b32.xlu1 %v292_v52, %s922_s18 }
 0x232   :  { %314 = vrot.lane.b32.xlu1 %v292_v52, %s923_s19  ;;  %v445_v52 = vld [vmem:[%s1127_s2 + $0x20] sm:$0xff] }
 0x28c   :  { %v294_v56 = vpop.permute.xlu1 %293 }
 0x28d   :  { %v318_v63 = vsel %vm317_vm4, %v267_v50, %v294_v56 }
 0x290   :  { %v300_v57 = vpop.permute.xlu1 %299  ;;  %v285_v58 = vpop.permute.xlu0 %284 }
 0x291   :  { %v287_v59 = vsub.f32 %v1004_v47, %v285_v58 }
 0x293   :  { %v337_v60 = vrot.slane %v287_v59, %v1006_v48 }
 0x294   :  { %v303_v61 = vpop.permute.xlu1 %302  ;;  %v297_v62 = vpop.permute.xlu0 %296 }
 0x295   :  { %356 = vrot.lane.b32.xlu1 %v337_v60, %s921_s17  ;;  %338 = vrot.lane.b32.xlu0 %v337_v60, %s907_s28  ;;  %v320_v2 = vsel %vm319_vm5, %v318_v63, %v297_v62  ;;  %s933_s17 = smov 17  }
 0x296   :  { %v322_v3 = vsel %vm321_vm6, %v320_v2, %v300_v57  ;;  %v443_v57 = vld [vmem:[%s1127_s2 + $0x10] sm:$0xff] }
 0x297   :  { %v324_v5 = vsel %vm323_vm7, %v322_v3, %v303_v61 }
 0x298   :  { %v306_v1 = vpop.permute.xlu1 %305 }
 0x299   :  { %341 = vrot.lane.b32.xlu0 %v337_v60, %s916_s13  ;;  %v326_v7 = vsel %vm325_vm8, %v324_v5, %v306_v1 }
 0x29c   :  { %v309_v4 = vpop.permute.xlu1 %308 }
 0x29d   :  { %344 = vrot.lane.b32.xlu0 %v337_v60, %s919_s15  ;;  %v328_v8 = vsel %vm327_vm9, %v326_v7, %v309_v4 }
 0x2a0   :  { %v312_v6 = vpop.permute.xlu1 %311 }
 0x2a1   :  { %347 = vrot.lane.b32.xlu0 %v337_v60, %s917_s14  ;;  %v330_v9 = vsel %vm329_vm10, %v328_v8, %v312_v6 }
 0x2a4   :  { %v315_v10 = vpop.permute.xlu1 %314 }
 0x2a5   :  { %v332_v11 = vsel %vm331_vm11, %v330_v9, %v315_v10  ;;  %350 = vrot.lane.b32.xlu0 %v337_v60, %s918_s4  ;;  %s931_s4 = smov 117  }
 0x2a6   :  { %374 = vrot.lane.b32.xlu1 %v332_v11, %s924_s20 }
 0x2a9   :  { %353 = vrot.lane.b32.xlu0 %v337_v60, %s920_s16  ;;  %s932_s16 = smov 123  }
 0x2ad   :  { %359 = vrot.lane.b32.xlu0 %v337_v60, %s922_s18  ;;  %v441_v60 = vld [vmem:[%s1127_s2] sm:$0xff] }
 0x2b1   :  { %377 = vrot.lane.b32.xlu0 %v332_v11, %s925_s21 }
 0x307   :  { %v339_v12 = vpop.permute.xlu0 %338  ;;  %v357_v26 = vpop.permute.xlu1 %356 }
 0x308   :  { %v362_v16 = vsel %vm317_vm4, %v339_v12, %v287_v59  ;;  %vm634_vm4 = vcmask 72704  }
 0x30b   :  { %v342_v13 = vpop.permute.xlu0 %341 }
 0x30c   :  { %v363_v19 = vsel %vm319_vm5, %v362_v16, %v342_v13  ;;  %vm677_vm5 = vcmask 97280  }
 0x30f   :  { %v345_v14 = vpop.permute.xlu0 %344 }
 0x310   :  { %v364_v20 = vsel %vm321_vm6, %v363_v19, %v345_v14  ;;  %vm754_vm6 = vcmask 76800  }
 0x313   :  { %v348_v15 = vpop.permute.xlu0 %347 }
 0x314   :  { %v365_v21 = vsel %vm323_vm7, %v364_v20, %v348_v15 }
 0x317   :  { %v351_v17 = vpop.permute.xlu0 %350 }
 0x318   :  { %v366_v23 = vsel %vm325_vm8, %v365_v21, %v351_v17  ;;  %v375_v31 = vpop.permute.xlu1 %374 }
 0x31b   :  { %v354_v24 = vpop.permute.xlu0 %353 }
 0x31c   :  { %v367_v25 = vsel %vm327_vm9, %v366_v23, %v354_v24 }
 0x31d   :  { %v368_v27 = vsel %vm329_vm10, %v367_v25, %v357_v26 }
 0x31f   :  { %v360_v28 = vpop.permute.xlu0 %359 }
 0x320   :  { %v369_v29 = vsel %vm331_vm11, %v368_v27, %v360_v28 }
 0x321   :  { %393 = vrot.lane.b32.xlu0 %v369_v29, %s925_s21  ;;  %390 = vrot.lane.b32.xlu1 %v369_v29, %s924_s20 }
 0x323   :  { %v378_v30 = vpop.permute.xlu0 %377 }
 0x324   :  { %v385_v32 = vsel %vm384_vm12, %v375_v31, %v378_v30 }
 0x325   :  { %387 = vrot.lane.b32.xlu0 %v369_v29, %s926_s22  ;;  %371 = vrot.lane.b32.xlu1 %v332_v11, %s926_s22  ;;  %v406_v33 = vrot.slane %v385_v32, %v1006_v48  ;;  %s935_s22 = smov 111  }
 0x327   :  { %v408_v37 = vmul.f32 %v406_v33, %v983_v22  ;;  %v446_v22 = vld [vmem:[%s1127_s2 + $0x28] sm:$0xff] }
 0x328   :  { %793 = vmatpush3.msra.mxu1 %v446_v22 }
 0x329   :  { %794 = vmatprep.subr.mxu1 %v903_v0 }
 0x32a   :  { %795 = vmatpush3.msra.mxu1 %v445_v52 }
 0x32b   :  { %796 = vmatprep.subr.mxu1 %v903_v0 }
 0x32c   :  { %797 = vmatpush3.msra.mxu1 %v444_v54 }
 0x32d   :  { %798 = vmatprep.subr.mxu1 %v903_v0 }
 0x32e   :  { %799 = vmatpush3.msra.mxu1 %v443_v57 }
 0x32f   :  { %800 = vmatprep.subr.mxu1 %v903_v0 }
 0x393   :  { %v391_v34 = vpop.permute.xlu1 %390  ;;  %v394_v35 = vpop.permute.xlu0 %393 }
 0x394   :  { %v398_v36 = vsel %vm384_vm12, %v391_v34, %v394_v35 }
 0x395   :  { %v416_v38 = vrot.slane %v398_v36, %v1006_v48 }
 0x397   :  { %v372_v41 = vpop.permute.xlu1 %371  ;;  %v388_v42 = vpop.permute.xlu0 %387  ;;  %v418_v43 = vadd.f32 %v416_v38, %v408_v37 }
 0x398   :  { %v381_v44 = vsel %vm380_vm13, %v332_v11, %v372_v41  ;;  %v396_v45 = vsel %vm380_vm13, %v369_v29, %v388_v42 }
 0x399   :  { %v383_v46 = vsel %vm382_vm15, %v381_v44, %v375_v31  ;;  %v397_v49 = vsel %vm382_vm15, %v396_v45, %v391_v34  ;;  %v420_v50 = vmax.f32 %v418_v43, 0.0 }
 0x39a   :  { %v402_v53 = vrot.slane %v383_v46, %v1006_v48  ;;  %v412_v55 = vrot.slane %v397_v49, %v1006_v48 }
 0x39b   :  { %427 = vrot.lane.b32.xlu1 %v420_v50, %s904_s0 }
 0x39c   :  { %v407_v56 = vmul.f32 %v402_v53, %v977_v18  ;;  %v442_v18 = vld [vmem:[%s1127_s2 + $0x8] sm:$0xff]  ;;  %s928_s2 = smov 122  }
 0x39d   :  { %801 = vmatpush3.msra.mxu1 %v442_v18 }
 0x39e   :  { %v417_v58 = vadd.f32 %v412_v55, %v407_v56  ;;  %802 = vmatprep.subr.mxu1 %v903_v0  ;;  %v668_v56 = vld [vmem:[%s1128_s3 + $0x8] sm:$0xf] }
 0x39f   :  { %803 = vmatpush3.msra.mxu1 %v441_v60  ;;  %808 = vmatpush3.msk.msra.mxu0 %vm128_vm1, %v668_v56  ;;  %vm630_vm1 = vcmask 23552  }
 0x3a0   :  { %v419_v59 = vmax.f32 %v417_v58, 0.0  ;;  %809 = vmatprep.subr.mxu0 %v903_v0  ;;  %v667_v58 = vld [vmem:[%s1128_s3] sm:$0xff]  ;;  %s937_s3 = smov [#allocation5]  }
 0x3a1   :  { %810 = vmatpush3.msra.mxu0 %v667_v58 }
 0x3a2   :  { %422 = vrot.lane.b32.xlu0 %v419_v59, %s904_s0  ;;  %s929_s0 = smov 125  }
 0x40d   :  { %v428_v61 = vpop.permute.xlu1 %427 }
 0x40e   :  { %v430_v62 = vmax.f32 %v419_v59, %v428_v61  ;;  %v431_v63 = vmax.f32 %v420_v50, %v428_v61 }
 0x410   :  { %436 = vrot.lane.b32.xlu0 %v431_v63, %s905_s26  ;;  %434 = vrot.lane.b32.xlu1 %v430_v62, %s905_s26  ;;  %s930_s26 = smov 119  }
 0x414   :  { %v423_v1 = vpop.permute.xlu0 %422 }
 0x415   :  { %v425_v2 = vmax.f32 %v419_v59, %v423_v1  ;;  %v673_v59 = vrot.slane %v1004_v47, %v1006_v48 }
 0x482   :  { %v437_v3 = vpop.permute.xlu0 %436  ;;  %v435_v4 = vpop.permute.xlu1 %434 }
 0x483   :  { %v438_v5 = vsel %vm170_vm3, %v435_v4, %v437_v3  ;;  %vm632_vm3 = vcmask 48128  }
 0x484   :  { %v440_v6 = vmax.f32 %v425_v2, %v438_v5 }
 0x486   :  { %805 = vmatmul.mubr.msk.f32.vlgmr.msra.gmra.mxu1 %vm380_vm13, %v440_v6 }
 0x546   :  { %v1093_v7 = vpop.f32.mrf.mxu1 }
 0x547   :  { %v527_v8 = vsel %vm526_vm2, %v1093_v7, 0.0  ;;  %v534_v9 = vmul.f32 %v1093_v7, %v1093_v7 }
 0x548   :  { %v528_v10 = vrot.slane %v527_v8, 4  ;;  %v806_v11 = vpop.f32.mrf.mxu1 }
 0x549   :  { %v535_v12 = vsel %vm526_vm2, %v534_v9, 0.0 }
 0x54a   :  { %v529_v13 = vadd.f32 %v528_v10, %v527_v8  ;;  %v536_v14 = vrot.slane %v535_v12, 4 }
 0x54c   :  { %v530_v15 = vrot.slane %v529_v13, 2  ;;  %v537_v16 = vadd.f32 %v536_v14, %v535_v12 }
 0x54e   :  { %v531_v17 = vadd.f32 %v530_v15, %v529_v13  ;;  %v538_v19 = vrot.slane %v537_v16, 2 }
 0x550   :  { %v532_v20 = vrot.slane %v531_v17, 1  ;;  %v539_v21 = vadd.f32 %v538_v19, %v537_v16 }
 0x552   :  { %v533_v23 = vadd.f32 %v532_v20, %v531_v17  ;;  %v540_v24 = vrot.slane %v539_v21, 1 }
 0x554   :  { %547 = vrot.lane.b32.xlu0 %v533_v23, %s928_s2  ;;  %543 = vrot.lane.b32.xlu1 %v533_v23, %s929_s0  ;;  %v541_v25 = vadd.f32 %v540_v24, %v539_v21 }
 0x558   :  { %551 = vrot.lane.b32.xlu0 %v533_v23, %s930_s26  ;;  %556 = vrot.lane.b32.xlu1 %v541_v25, %s929_s0 }
 0x55c   :  { %564 = vrot.lane.b32.xlu0 %v541_v25, %s930_s26  ;;  %560 = vrot.lane.b32.xlu1 %v541_v25, %s928_s2 }
 0x5c6   :  { %v548_v26 = vpop.permute.xlu0 %547  ;;  %v544_v27 = vpop.permute.xlu1 %543 }
 0x5c7   :  { %v546_v28 = vadd.f32 %v544_v27, %v533_v23 }
 0x5c9   :  { %v550_v29 = vadd.f32 %v548_v26, %v546_v28 }
 0x5ca   :  { %v552_v30 = vpop.permute.xlu0 %551  ;;  %v557_v31 = vpop.permute.xlu1 %556 }
 0x5cb   :  { %v554_v32 = vadd.f32 %v552_v30, %v550_v29  ;;  %v559_v33 = vadd.f32 %v557_v31, %v541_v25 }
 0x5cd   :  { %v568_v35 = vmul.f32 0.0625, %v554_v32 }
 0x5ce   :  { %v561_v34 = vpop.permute.xlu1 %560  ;;  %v565_v37 = vpop.permute.xlu0 %564 }
 0x5cf   :  { %v563_v36 = vadd.f32 %v561_v34, %v559_v33  ;;  %v570_v39 = vmul.f32 %v568_v35, %v568_v35 }
 0x5d1   :  { %v567_v38 = vadd.f32 %v565_v37, %v563_v36 }
 0x5d3   :  { %v569_v40 = vmul.f32 0.0625, %v567_v38 }
 0x5d5   :  { %v571_v41 = vsub.f32 %v569_v40, %v570_v39 }
 0x5d7   :  { %v572_v42 = vadd.f32 1e-05, %v571_v41 }
 0x5d9   :  { %854 = vrsqrt.f32 %v572_v42 }
 0x5e6   :  { %v855_v43 = vpop.eup %854 }
 0x5e7   :  { %v581_v22 = vrot.slane %v855_v43, %v1009_v51 }
 0x5e9   :  { %v588_v44 = vrot.slane %v581_v22, %v1009_v51 }
 0x5eb   :  { %589 = vrot.lane.b32.xlu1 %v588_v44, %s919_s15  ;;  %s934_s15 = smov 120  }
 0x65d   :  { %v590_v45 = vpop.permute.xlu1 %589 }
 0x65e   :  { %v592_v46 = vmul.f32 %v590_v45, %v1004_v47 }
 0x660   :  { %v597_v49 = vrot.slane %v592_v46, %v1006_v48 }
 0x662   :  { %598 = vrot.lane.b32.xlu0 %v597_v49, %s908_s29 }
 0x666   :  { %621 = vrot.lane.b32.xlu0 %v597_v49, %s931_s4 }
 0x66a   :  { %627 = vrot.lane.b32.xlu0 %v597_v49, %s932_s16 }
 0x6d4   :  { %v599_v50 = vpop.permute.xlu0 %598 }
 0x6d5   :  { %v601_v52 = vmul.f32 %v599_v50, %v568_v35 }
 0x6d7   :  { %v609_v53 = vrot.slane %v601_v52, %v1009_v51 }
 0x6d8   :  { %v622_v18 = vpop.permute.xlu0 %621 }
 0x6d9   :  { %v616_v54 = vrot.slane %v609_v53, %v1009_v51  ;;  %v631_v60 = vsel %vm630_vm1, %v599_v50, %v622_v18 }
 0x6db   :  { %617 = vrot.lane.b32.xlu1 %v616_v54, %s933_s17 }
 0x6dc   :  { %v628_v61 = vpop.permute.xlu0 %627 }
 0x6df   :  { %624 = vrot.lane.b32.xlu1 %v597_v49, %s934_s15 }
 0x74d   :  { %v618_v55 = vpop.permute.xlu1 %617 }
 0x74e   :  { %v620_v57 = vsub.f32 %v1004_v47, %v618_v55 }
 0x750   :  { %v640_v51 = vrot.slane %v620_v57, %v1006_v48 }
 0x751   :  { %v625_v0 = vpop.permute.xlu1 %624 }
 0x752   :  { %644 = vrot.lane.b32.xlu0 %v640_v51, %s908_s29  ;;  %641 = vrot.lane.b32.xlu1 %v640_v51, %s935_s22  ;;  %v633_v62 = vsel %vm632_vm3, %v631_v60, %v625_v0  ;;  %s762_s29 = sshll.u32 %s937_s3, 4  ;;  %s763_s29 = int_to_ptr.vmem [resolvable:$true] %s762_s29 }
 0x753   :  { %v635_v63 = vsel %vm634_vm4, %v633_v62, %v628_v61  ;;  %s876_s24 = scalar_lea.vmem %s763_s29, 64  ;;  %p881_p6 = scmp.lt.s32.totalorder %s763_s29, %s763_s29 }
 0x754   :  { %v659_v3 = vrot.slane %v635_v63, %v1006_v48  ;;  %p877_p5 = scmp.ne.s32.totalorder %s763_s29, %s876_s24  ;;  %p882_p7 = scmp.lt.s32.totalorder %s876_s24, %s876_s24 }
 0x756   :  { %650 = vrot.lane.b32.xlu0 %v640_v51, %s934_s15  ;;  %647 = vrot.lane.b32.xlu1 %v640_v51, %s931_s4  ;;  %v660_v9 = vmul.f32 %v659_v3, %v1093_v7  ;;  %p883_p8 = por %p882_p7, %p881_p6 }
 0x758   :  { %p884_p9 = pnand %p883_p8, %p877_p5 }
 0x75a   :  { %674 = vrot.lane.b32.xlu1 %v673_v59, %s936_s23 }
 0x7c4   :  { %v642_v1 = vpop.permute.xlu1 %641  ;;  %v645_v2 = vpop.permute.xlu0 %644 }
 0x7c5   :  { %v653_v4 = vsel %vm630_vm1, %v642_v1, %v645_v2 }
 0x7c8   :  { %v648_v5 = vpop.permute.xlu1 %647  ;;  %v651_v6 = vpop.permute.xlu0 %650 }
 0x7c9   :  { %v654_v8 = vsel %vm632_vm3, %v653_v4, %v648_v5 }
 0x7ca   :  { %v655_v47 = vsel %vm634_vm4, %v654_v8, %v651_v6 }
 0x7cb   :  { %v664_v10 = vrot.slane %v655_v47, %v1006_v48 }
 0x7cc   :  { %v675_v13 = vpop.permute.xlu1 %674 }
 0x7cd   :  { %v665_v11 = vadd.f32 %v664_v10, %v660_v9 }
 0x7cf   :  { %v666_v12 = vmax.f32 %v665_v11, 0.0 }
 0x7d1   :  { %812 = vmatmul.mubr.msk.f32.vlgmr.msra.gmra.mxu0 %vm677_vm5, %v666_v12 }
 0x891   :  { %v750_v14 = vpop.f32.mrf.mxu0 }
 0x892   :  { %v751_v15 = vadd.f32 %v750_v14, %v675_v13 }
 0x893   :  { %v813_v16 = vpop.f32.mrf.mxu0 }
 0x894   :  { %755 = vst.msk [vmem:[#allocation5] sm:$0xf] %vm754_vm6, %v751_v15 }
 0x895   :  { %887 = shalt.err (!%p884_p9)
}
 0x896   :  { %765 = dma.vmem_to_hbm [thread:$0]  %s763_s29, 64, %s1130_s5, [#allocation4]  }
 0x897   :  { %898 = dma.done.wait [#allocation4], 64  }
 0x898   :  { %899 = vsyncadd [#allocation4], 4294967232 }
 0x899   :  { %769 = vsyncpa [#allocation3], 1 }
 0x89a   :  { %770 = vsyncpa [#allocation4], 1 }

</bundles_post_ra>
